<compile_context>
chip_gen: v6e
topology: v6e:2x2x1
jax: 0.10.0
libtpu: 0.0.40
codegen_flags: <defaults>
</compile_context>

<pallas_src>
import jax
import jax.numpy as jnp
from jax.experimental import pallas as pl
from jax.experimental.pallas import tpu as pltpu


def _shortcut_kernel(x_ref, w_ref, b_ref, o_ref):
    # x_ref: (1, Cin, tp)  bf16  -- pixels on the lane axis
    # w_ref: (tco, Cin)    bf16  -- BN scale already folded in
    # b_ref: (tco, 1)      f32   -- folded BN bias
    # o_ref: (1, tco, tp)  out dtype (bf16 by default)
    y = jnp.dot(w_ref[...], x_ref[0], preferred_element_type=jnp.float32)   # MXU
    o_ref[0] = (y + b_ref[...]).astype(o_ref.dtype)                         # VPU epilogue


def _shortcut_residual_kernel(x_ref, w_ref, b_ref, r_ref, o_ref):
    # Same as above + fused residual add (r_ref: (1, tco, tp)).
    y = jnp.dot(w_ref[...], x_ref[0], preferred_element_type=jnp.float32)
    o_ref[0] = (y + b_ref[...] + r_ref[0].astype(jnp.float32)).astype(o_ref.dtype)


def _pick_pixel_tile(P, n_outer_steps, tp_max):
    """Pixel tile: multiple of 128, as big as allowed, but split enough for megacore."""
    LANE = 128
    P128 = pl.cdiv(P, LANE) * LANE
    tp = max(LANE, (min(tp_max, P128) // LANE) * LANE)
    # v7x has 2 TensorCores; keep >= ~8 total grid steps when possible.  512-wide
    # tiles already sit at ~85% of the HBM roofline, so splitting costs little.
    floor = min(512, tp)
    while tp > floor and n_outer_steps * pl.cdiv(P, tp) < 8:
        tp -= LANE
    return tp


def shortcut_forward(x_nchw, conv_w, gamma, beta, running_mean, running_var,
                     *, stride, eps=1e-5, residual=None,
                     out_dtype=jnp.bfloat16, tp_max=1024):
    """BatchNorm2d(Conv2d(Cin, Cout, k=1, stride, bias=False)(x)), eval mode, NCHW.

    If `residual` (N, Cout, Ho, Wo) is given, returns conv_bn(x) + residual with the
    add fused into the kernel epilogue.
    """
    N, Cin, H, W = x_nchw.shape
    Cout = conv_w.shape[0]

    # ---- fold BN (eval mode) into weight scale + per-channel bias (f32) -----
    scale = gamma.astype(jnp.float32) / jnp.sqrt(running_var.astype(jnp.float32) + eps)
    bias = (beta.astype(jnp.float32)
            - running_mean.astype(jnp.float32) * scale).reshape(Cout, 1)
    w = (conv_w.reshape(Cout, Cin).astype(jnp.float32)
         * scale[:, None]).astype(jnp.bfloat16)

    # ---- spatial stride + flatten pixels (stays NCHW, no transposes) --------
    x_s = x_nchw[:, :, ::stride, ::stride]                     # (N, Cin, Ho, Wo)
    Ho, Wo = x_s.shape[2], x_s.shape[3]
    P = Ho * Wo
    # slice + reshape + bf16 cast fuse into a single XLA pass over x; handing x in
    # bf16 from the producer halves even that glue read.
    x_rows = x_s.reshape(N, Cin, P).astype(jnp.bfloat16)       # (N, Cin, P)

    # ---- tiling --------------------------------------------------------------
    tco = Cout if Cout <= 512 else 512          # Cout tile (weight resident per tile)
    n_co = pl.cdiv(Cout, tco)
    tp = _pick_pixel_tile(P, N * n_co, tp_max)  # pixel tile, multiple of 128
    n_p = pl.cdiv(P, tp)                        # ragged: partial last block is masked
    grid = (N, n_co, n_p)                       # pixels innermost -> weight stays put

    # Single-buffer the weight only when it is big enough to matter for VMEM
    # (v7x: 64 MiB physical, 32 MiB scoped default); it is constant per co-tile.
    big_weight = Cout * Cin >= (1 << 20)
    if big_weight:
        w_spec = pl.BlockSpec((tco, Cin), lambda n, co, j: (co, 0),
                              pipeline_mode=pl.Buffered(1))
    else:
        w_spec = pl.BlockSpec((tco, Cin), lambda n, co, j: (co, 0))

    in_specs = [
        pl.BlockSpec((1, Cin, tp), lambda n, co, j: (n, 0, j)),
        w_spec,
        pl.BlockSpec((tco, 1), lambda n, co, j: (co, 0)),
    ]
    inputs = [x_rows, w, bias]
    kernel = _shortcut_kernel
    res_itemsize = 0
    if residual is not None:
        r_rows = residual.reshape(N, Cout, P)
        in_specs.append(pl.BlockSpec((1, tco, tp), lambda n, co, j: (n, co, j)))
        inputs.append(r_rows)
        kernel = _shortcut_residual_kernel
        res_itemsize = r_rows.dtype.itemsize

    out_itemsize = jnp.dtype(out_dtype).itemsize

    # ---- VMEM budget (explicit limit, portable across 16/32 MiB scoped defaults) --
    vmem_bytes = (2 * Cin * tp * 2                                   # x (bf16, 2 bufs)
                  + 2 * tco * tp * out_itemsize                      # out (2 bufs)
                  + (1 if big_weight else 2) * tco * Cin * 2         # weight
                  + 2 * tco * 4)                                     # bias
    if residual is not None:
        vmem_bytes += 2 * tco * tp * res_itemsize
    vmem_limit = int(min(64 << 20, max(vmem_bytes + (4 << 20), 16 << 20)))

    # ---- cost estimate (helps XLA overlap neighbors with this mem-bound call) -----
    bytes_accessed = (N * Cin * P * 2 + Cout * Cin * 2 + Cout * 4
                      + N * Cout * P * out_itemsize
                      + (N * Cout * P * res_itemsize if residual is not None else 0))
    cost = pl.CostEstimate(flops=2 * N * Cout * Cin * P,
                           transcendentals=0,
                           bytes_accessed=bytes_accessed)

    out_rows = pl.pallas_call(
        kernel,
        out_shape=jax.ShapeDtypeStruct((N, Cout, P), out_dtype),   # exact P: no un-pad pass
        grid=grid,
        in_specs=in_specs,
        out_specs=pl.BlockSpec((1, tco, tp), lambda n, co, j: (n, co, j)),
        compiler_params=pltpu.CompilerParams(
            dimension_semantics=("parallel", "parallel", "parallel"),
            vmem_limit_bytes=vmem_limit),
        cost_estimate=cost,
    )(*inputs)

    # contiguous reshape only; no slice, no extra HBM pass
    return out_rows.reshape(N, Cout, Ho, Wo)


if __name__ == "__main__":
    # Module config (synthetic, deterministic): in=4, out=8, stride=2
    in_channels, out_channels, stride = 4, 8, 2
    N, H, W = 2, 16, 16

    key = jax.random.PRNGKey(0)
    k_x, k_w, k_g, k_b, k_m, k_v, k_r = jax.random.split(key, 7)

    x = jax.random.normal(k_x, (N, in_channels, H, W), dtype=jnp.float32)
    conv_w = jax.random.normal(k_w, (out_channels, in_channels, 1, 1),
                               dtype=jnp.float32) * 0.1
    gamma = 1.0 + 0.1 * jax.random.normal(k_g, (out_channels,), dtype=jnp.float32)
    beta = 0.1 * jax.random.normal(k_b, (out_channels,), dtype=jnp.float32)
    running_mean = 0.05 * jax.random.normal(k_m, (out_channels,), dtype=jnp.float32)
    running_var = 1.0 + 0.1 * jax.random.uniform(k_v, (out_channels,), dtype=jnp.float32)

    out = shortcut_forward(x, conv_w, gamma, beta, running_mean, running_var,
                           stride=stride)
    out = jax.block_until_ready(out)

    eps = 1e-5
    Ho, Wo = H // stride, W // stride
    assert out.shape == (N, out_channels, Ho, Wo)
    assert out.dtype == jnp.bfloat16
    out_f32 = out.astype(jnp.float32)

    xs = x[:, :, ::stride, ::stride]
    scale = gamma / jnp.sqrt(running_var + eps)
    bias = beta - running_mean * scale
    w2d = conv_w.reshape(out_channels, in_channels)

    # (1) Tight kernel-math check against a reference using the same bf16-rounded
    #     operands with f32 accumulation; tolerance covers the bf16 output rounding.
    y_bf16_ref = jnp.einsum(
        'nchw,oc->nohw',
        xs.astype(jnp.bfloat16).astype(jnp.float32),
        (w2d * scale[:, None]).astype(jnp.bfloat16).astype(jnp.float32),
    ) + bias[None, :, None, None]
    assert jnp.allclose(out_f32, y_bf16_ref, atol=1e-2, rtol=1e-2)

    # (2) Module-semantics check against the pure-f32 eval-mode reference
    #     (tolerance widened for bf16 matmul inputs + bf16 output).
    y_f32 = jnp.einsum('nchw,oc->nohw', xs, w2d)
    y_f32 = (y_f32 - running_mean[None, :, None, None]) / jnp.sqrt(
        running_var[None, :, None, None] + eps)
    y_f32 = y_f32 * gamma[None, :, None, None] + beta[None, :, None, None]
    assert jnp.allclose(out_f32, y_f32, atol=4e-2, rtol=4e-2)

    # (3) Fused residual-add epilogue path.
    residual = jax.random.normal(k_r, (N, out_channels, Ho, Wo), dtype=jnp.float32)
    out_r = shortcut_forward(x, conv_w, gamma, beta, running_mean, running_var,
                             stride=stride, residual=residual)
    out_r = jax.block_until_ready(out_r)
    assert jnp.allclose(out_r.astype(jnp.float32), y_bf16_ref + residual,
                        atol=2e-2, rtol=2e-2)

    print("KERNEL_OK")
</pallas_src>

<mosaic_0001>
module attributes {stable_mosaic.version = 11 : i64} {
  func.func @_shortcut_kernel(%arg0: i32, %arg1: i32, %arg2: i32, %arg3: memref<1x4x128xbf16, #tpu.memory_space<vmem>>, %arg4: memref<8x4xbf16, #tpu.memory_space<vmem>>, %arg5: memref<8x1xf32, #tpu.memory_space<vmem>>, %arg6: memref<1x8x128xbf16, #tpu.memory_space<vmem>>) attributes {dimension_semantics = [#tpu.dimension_semantics<parallel>, #tpu.dimension_semantics<parallel>, #tpu.dimension_semantics<parallel>], iteration_bounds = array<i64: 2, 1, 1>, scalar_prefetch = 0 : i64, scratch_operands = 0 : i64, tpu.core_type = #tpu.core_type<tc>, window_params = [{transform_indices = @transform_0, window_bounds = array<i64: 1, 4, 128>}, {transform_indices = @transform_1, window_bounds = array<i64: 8, 4>}, {transform_indices = @transform_2, window_bounds = array<i64: 8, 1>}, {transform_indices = @transform_3, window_bounds = array<i64: 1, 8, 128>}]} {
    %c0 = arith.constant 0 : index
    %c0_0 = arith.constant 0 : index
    %0 = vector.load %arg4[%c0, %c0_0] : memref<8x4xbf16, #tpu.memory_space<vmem>>, vector<8x4xbf16>
    %c0_1 = arith.constant 0 : index
    %c0_2 = arith.constant 0 : index
    %c0_3 = arith.constant 0 : index
    %1 = vector.load %arg3[%c0_1, %c0_2, %c0_3] : memref<1x4x128xbf16, #tpu.memory_space<vmem>>, vector<1x4x128xbf16>
    %2 = vector.shape_cast %1 : vector<1x4x128xbf16> to vector<4x128xbf16>
    %cst = arith.constant dense<0.000000e+00> : vector<8x128xf32>
    %3 = tpu.matmul %0, %2, %cst {dimension_numbers = #tpu.dot_dimension_numbers<[1], [0], [0], [1], [0, 0, 1, 1], [], []>} : vector<8x4xbf16>, vector<4x128xbf16>, vector<8x128xf32> -> vector<8x128xf32>
    %c0_4 = arith.constant 0 : index
    %c0_5 = arith.constant 0 : index
    %4 = vector.load %arg5[%c0_4, %c0_5] : memref<8x1xf32, #tpu.memory_space<vmem>>, vector<8x1xf32>
    %5 = vector.broadcast %4 : vector<8x1xf32> to vector<8x128xf32>
    %6 = arith.addf %3, %5 : vector<8x128xf32>
    %7 = arith.truncf %6 : vector<8x128xf32> to vector<8x128xbf16>
    %c0_6 = arith.constant 0 : index
    %c0_7 = arith.constant 0 : index
    %c0_8 = arith.constant 0 : index
    %8 = vector.load %arg6[%c0_6, %c0_7, %c0_8] : memref<1x8x128xbf16, #tpu.memory_space<vmem>>, vector<1x8x128xbf16>
    %9 = vector.shape_cast %8 : vector<1x8x128xbf16> to vector<8x128xbf16>
    %10 = vector.shape_cast %7 : vector<8x128xbf16> to vector<1x8x128xbf16>
    tpu.vector_store %arg6[%c0_6, %c0_7, %c0_8], %10 {strides = array<i32>} : memref<1x8x128xbf16, #tpu.memory_space<vmem>>, vector<1x8x128xbf16>,
    return
  }
  func.func @transform_0(%arg0: i32, %arg1: i32, %arg2: i32) -> (i32, i32, i32) {
    %c0_i32 = arith.constant 0 : i32
    %c0_i32_0 = arith.constant 0 : i32
    return %arg0, %c0_i32, %arg2 : i32, i32, i32
  }
  func.func @transform_1(%arg0: i32, %arg1: i32, %arg2: i32) -> (i32, i32) {
    %c0_i32 = arith.constant 0 : i32
    %c0_i32_0 = arith.constant 0 : i32
    return %arg1, %c0_i32 : i32, i32
  }
  func.func @transform_2(%arg0: i32, %arg1: i32, %arg2: i32) -> (i32, i32) {
    %c0_i32 = arith.constant 0 : i32
    %c0_i32_0 = arith.constant 0 : i32
    return %arg1, %c0_i32 : i32, i32
  }
  func.func @transform_3(%arg0: i32, %arg1: i32, %arg2: i32) -> (i32, i32, i32) {
    %c0_i32 = arith.constant 0 : i32
    return %arg0, %arg1, %arg2 : i32, i32, i32
  }
}

</mosaic_0001>

<bundles_post_ra>
// kernel: tpu_custom_call.1
= control target key start
LH: loop header
LB: loop body
LE: loop exit
PB: predicated region body
PF: predicated region fallthrough
CT: control target
= control target key end

     0   :  { %8 = vsyncpa [#allocation3], 0  ;;  %s714_s0 = inlined_call_operand.vmem [shape: bf16[2,4,64], index: 0, kind: input, shape index: {}]   ;;  %s715_s1 = inlined_call_operand.vmem [shape: bf16[8,4], index: 1, kind: input, shape index: {}]   ;;  %s716_s2 = inlined_call_operand.vmem [shape: f32[8,1], index: 2, kind: input, shape index: {}]   ;;  %s717_s3 = inlined_call_operand.hbm [shape: bf16[2,8,64], index: 3, kind: output, shape index: {}]  }
   0x1   :  { %10 = vsyncpa [#allocation3 + $0x1], 0  ;;  %s597_s12 = smov 0   ;;  %s599_s13 = smov 0  }
   0x2   :  { %s601_s14 = smov 0   ;;  %s603_s15 = smov 0  }
   0x3   :  { %s605_s16 = smov 0   ;;  %s607_s17 = smov 0  }
   0x4 LB: > { %s414_s18 = sadd.s32 4294967295, %s571_s17   ;;  %s415_s19 = sadd.s32 4294967294, %s571_s17   ;;  %s571_s17 = sphi %s607_s17, %s16_s17   ;;  %s567_s16 = sphi %s605_s16, %s724_s16   ;;  %s563_s15 = sphi %s603_s15, %s723_s15   ;;  %s559_s14 = sphi %s601_s14, %s722_s14   ;;  %s555_s13 = sphi %s599_s13, %s721_s13   ;;  %s551_s12 = sphi %s597_s12, %s720_s12  }
   0x5   : > { %s35_s20 = sadd.s32 1, %s567_s16  ;;  %s126_s21 = sadd.s32 1, %s559_s14 }
   0x6   : > { %p37_p0 = scmp.ge.s32.totalorder %s35_s20, 2  ;;  %p136_p1 = scmp.ne.s32.totalorder %s559_s14, %s555_s13 }
   0x7   : > { %p137_p2 = scmp.eq.s32.totalorder %s414_s18, 1  ;;  %p142_p3 = scmp.ne.s32.totalorder %s555_s13, %s551_s12 }
   0x8   : > { %s726_s20 = smov (%p37_p0, %s35_s20), 0  ;;  %p143_p5 = scmp.eq.s32.totalorder %s415_s19, 1 }
   0x9   : > { %p637_p4 = por %p137_p2, %p136_p1  ;;  %s119_s23 = ssub.s32 %s567_s16, %s726_s20 }
   0xa   : > { %p420_p6 = scmp.ge.s32.totalorder %s571_s17, 1  ;;  %p124_p7 = scmp.eq.s32.totalorder %s119_s23, 0 }
   0xb   : > { %p644_p8 = por %p143_p5, %p142_p3  ;;  %p185_p9 = scmp.lt.s32.totalorder %s571_s17, 3 }
   0xc   : > { %s650_s25 = scalar_select %p124_p7, %s559_s14, %s126_s21  }
   0xd   : > { %p186_p10 = pnand %p420_p6, %p185_p9 }
   0xe   : > { %p219_p11 = scmp.lt.s32.totalorder (!%p186_p10), %s563_s15, 1  ;;  %s216_s8 = sand.u32 (!%p186_p10), 1, %s555_s13  }
   0xf   : > { %189 = sbr.rel (%p186_p10) target bundleno = 240 (0xf0), region = 32  ;;  %s421_s9 = sshll.u32 (!%p186_p10), %s216_s8, 2 }
  0x10   : > { %s425_s10 = sshll.u32 (!%p186_p10), %s563_s15, 6  ;;  %s218_s11 = scalar_lea.vmem (!%p186_p10), [#allocation2], %s421_s9 }
  0x11   : > { %s309_s18 = sshll.u32 (!%p186_p10), %s218_s11, 4  ;;  %s668_s23 = scalar_lea.hbm (!%p186_p10), %s717_s3, %s425_s10  ;;  %s670_s18 = int_to_ptr.vmem [resolvable:$true] %s309_s18 }
  0x12   : > { %s294_s26 = scalar_lea.sflag (!%p186_p10), [#allocation3], %s216_s8  ;;  %s576_s27 = smov (!%p186_p10), [#allocation2]  }
  0x14   : > { %v573_v0 = vmov 0.0   ;;  %vm574_vm0 = vmmov 0   ;;  %v237_v1 = vld [vmem:[%s716_s2] sm:$0xff]  ;;  %s220_s28 = scalar_select %p219_p11, %s563_s15, 1  ;;  %v575_v2 = vmov 0   ;;  %vm247_vm1 = vcmask 1041408  }
  0x15   : > { %430 = vmatprep.subr.bf16.mxu0 %v573_v0  ;;  %432 = vmatprep.mubr.msk.bf16.mxu0 %vm574_vm0, %v573_v0  ;;  %v235_v5 = vld [vmem:[%s715_s1] sm:$0xf]  ;;  %vm243_vm2 = vcmask 31744   ;;  %s495_s15 = scalar_lea.vmem %s670_s18, 64 }
  0x16   : > { %494 = vset.pattern.permute.xlu0 %v575_v2  ;;  %s422_s29 = sshll.u32 %s220_s28, 1  ;;  %p496_p12 = scmp.ne.s32.totalorder %s670_s18, %s495_s15 }
  0x17   : > { %240 = vperm.xlu0 %494, %v237_v1   ;;  %s225_s5 = scalar_lea.vmem %s714_s0, %s422_s29  ;;  %s499_s28 = sshll.u32 %s576_s27, 4  ;;  %s500_s28 = int_to_ptr.vmem [resolvable:$false] %s499_s28 }
  0x18   : > { %v236_v3 = vld [vmem:[%s225_s5] sm:$0x3]  ;;  %p497_p13 = pnand %p496_p12, %p637_p4  ;;  %s501_s29 = scalar_lea.vmem %s500_s28, 128 }
  0x19   : > { %v249_v4 = vsel %vm247_vm1, %v236_v3, 0  ;;  %p502_p1 = scmp.lt.s32.totalorder %s670_s18, %s500_s28  ;;  %p503_p2 = scmp.lt.s32.totalorder %s501_s29, %s495_s15 }
  0x1a   : > { %431 = vmatpush3.bf16.msra.mxu0 %v249_v4  ;;  %p498_p0 = pneg %p497_p13 }
  0x1b   : > { %p504_p3 = por %p503_p2, %p502_p1 }
  0x1d   : > { %433 = vmatmul.mubr.msk.bf16.vlgmr.msra.gmra.mxu0 %vm243_vm2, %v235_v5  ;;  %p505_p5 = pnand %p504_p3, %p498_p0 }
  0x92   : > { %v241_v6 = vpop.permute.xlu0 %240 }
  0xdd   : > { %v285_v7 = vpop.f32.mrf.mxu0 }
  0xde   : > { %v286_v8 = vadd.f32 %v285_v7, %v241_v6 }
  0xdf   : > { %v434_v9 = vpop.f32.mrf.mxu0 }
  0xe0   : > { %v291_v10 = vpack.c.bf16 %v286_v8, %v286_v8 }
  0xe1   : > { %v288_v11 = vpop.f32.mrf.mxu0 }
  0xe2   : > { %292 = vst [vmem:[%s218_s11] sm:$0xf] %v291_v10 }
  0xe3   : > { %v435_v12 = vpop.f32.mrf.mxu0 }
  0xe4   : > { %508 = shalt.err (!%p505_p5)
}
  0xe5   : > { %s509_s30 = scalar_lea.hbm %s668_s23, 64  ;;  %s513_s6 = scalar_lea.hbm %s717_s3, 128 }
  0xe6   : > { %p510_p6 = scmp.ne.s32.totalorder %s668_s23, %s509_s30  ;;  %p514_p10 = scmp.lt.s32.totalorder %s668_s23, %s717_s3 }
  0xe7   : > { %p515_p11 = scmp.lt.s32.totalorder %s513_s6, %s509_s30 }
  0xe8   : > { %p511_p7 = pnand %p510_p6, %p637_p4 }
  0xe9   : > { %p516_p12 = por %p515_p11, %p514_p10 }
  0xea   : > { %p512_p9 = pneg %p511_p7 }
  0xec   : > { %p517_p13 = pnand %p516_p12, %p512_p9 }
  0xee   : > { %520 = shalt.err (!%p517_p13)
}
  0xef   : > { %436 = dma.vmem_to_hbm [thread:$0]  (%p637_p4), %s670_s18, 64, %s668_s23, %s294_s26  }
  0xf0 PF: > { %p442_p0 = scmp.ge.s32.totalorder %s571_s17, 2  ;;  %s321_s9 = sand.u32 1, %s551_s12  }
  0xf1   : > { %s322_s10 = scalar_lea.sflag [#allocation3], %s321_s9 }
  0xf2   : > { %p439_p1 = pnand %p442_p0, %p644_p8 }
  0xf4   : > { %p440_p2 = pneg %p439_p1 }
  0xf6   : > { %546 = dma.done.wait (%p440_p2), %s322_s10, 64  }
  0xf7   : > { %548 = vsyncadd (%p440_p2), %s322_s10, 4294967232  ;;  %s16_s17 = sadd.s32 1, %s571_s17   ;;  %s720_s12 = smov %s555_s13 }
  0xf8   : > { %p13_p3 = scmp.ge.s32.totalorder %s16_s17, 4   ;;  %s721_s13 = smov %s559_s14 }
  0xf9   : > { %s722_s14 = smov %s650_s25  ;;  %s723_s15 = smov %s567_s16 }
  0xfa   : > { %s724_s16 = smov %s726_s20  ;;  %15 = sbr.rel (!%p13_p3) target bundleno = 4 (0x4), region = 73 }
  0xff   :  { %327 = vsyncpa [#allocation3], 1 }
 0x100   :  { %329 = vsyncpa [#allocation3 + $0x1], 1 }

</bundles_post_ra>
